<compile_context>
chip_gen: v7x
topology: tpu7x:2x2x1
jax: 0.10.0
libtpu: 0.0.40
codegen_flags: <defaults>
</compile_context>

<pallas_src>
import jax
import jax.numpy as jnp
from jax import lax
from jax.experimental import pallas as pl
from jax.experimental.pallas import tpu as pltpu

# Fixed Gaussian kernel from the PyTorch module (non-trainable parameter).
GAUSS_KERNEL = (
    (0.0007, 0.0063, 0.0129, 0.0063, 0.0007),
    (0.0063, 0.0543, 0.1116, 0.0543, 0.0063),
    (0.0129, 0.1116, 0.2292, 0.1116, 0.0129),
    (0.0063, 0.0543, 0.1116, 0.0543, 0.0063),
    (0.0007, 0.0063, 0.0129, 0.0063, 0.0007),
)
KSIZE = 5
PAD = 2


def _blur_kernel(x_ref, o_ref, xpad_ref):
    # x_ref:    (T, H, W)         unpadded input block
    # o_ref:    (T, H, W)         blurred output block
    # xpad_ref: (T, H+4, W+4) f32 scratch holding the zero-padded image
    T, H, W = o_ref.shape
    HP, WP = H + 2 * PAD, W + 2 * PAD

    # Fused zero padding: zero ONLY the 2-wide halo strips (the interior is fully
    # overwritten every grid step), then write the interior once (single dtype cast).
    zrow = jnp.zeros((T, PAD, WP), jnp.float32)
    zcol = jnp.zeros((T, HP, PAD), jnp.float32)
    xpad_ref[:, :PAD, :] = zrow
    xpad_ref[:, PAD + H:, :] = zrow
    xpad_ref[:, :, :PAD] = zcol
    xpad_ref[:, :, PAD + W:] = zcol
    xpad_ref[:, PAD:PAD + H, PAD:PAD + W] = x_ref[...].astype(jnp.float32)

    # Vertical pass: the Gaussian is flip-symmetric (row0 == row4, row1 == row3), so
    # pair the symmetric padded-row windows first. These are 5 lane-aligned,
    # sublane-offset loads straight from the scratch ref (no materialized padded copy).
    v0 = xpad_ref[:, 0:H, :] + xpad_ref[:, 4:4 + H, :]
    v1 = xpad_ref[:, 1:1 + H, :] + xpad_ref[:, 3:3 + H, :]
    v2 = xpad_ref[:, 2:2 + H, :]

    # Horizontal pass: each kernel row is itself symmetric [a, b, c, b, a], so the
    # 5 taps cost 4 adds + 3 muls per row group. Shifted windows are value slices of
    # the already-loaded rows (resolved in-register), not re-reads of the scratch.
    def hconv(v, a, b, c):
        outer = v[:, :, 0:W] + v[:, :, 4:4 + W]
        inner = v[:, :, 1:1 + W] + v[:, :, 3:3 + W]
        return a * outer + b * inner + c * v[:, :, 2:2 + W]

    acc = (hconv(v0, GAUSS_KERNEL[0][0], GAUSS_KERNEL[0][1], GAUSS_KERNEL[0][2])
           + hconv(v1, GAUSS_KERNEL[1][0], GAUSS_KERNEL[1][1], GAUSS_KERNEL[1][2])
           + hconv(v2, GAUSS_KERNEL[2][0], GAUSS_KERNEL[2][1], GAUSS_KERNEL[2][2]))
    o_ref[...] = acc.astype(o_ref.dtype)


def _vmem_capacity_bytes():
    """Per-core VMEM capacity, queried per TPU generation (with a safe fallback)."""
    try:
        info = pltpu.get_tpu_info()
        cap = getattr(info, "vmem_capacity_bytes", None)
        if cap:
            return int(cap)
    except Exception:
        pass
    return 64 * 1024 * 1024  # conservative: v7x per-TensorCore VMEM


def gaussian_blur5(x):
    """x: (B, C, H, W) -> (B, C, H, W) blurred (matches F.conv2d(weight, padding=2))."""
    b, c, h, w = x.shape
    bc = b * c
    hp, wp = h + 2 * PAD, w + 2 * PAD
    x_flat = x.reshape(bc, h, w)
    itemsize = jnp.dtype(x.dtype).itemsize

    # Generation-aware VMEM budgeting: ~96 MiB limit on v5e/v6e (128 MiB VMEM),
    # ~48 MiB on v7x (64 MiB per-TC), with headroom for Mosaic internal scratch.
    vmem_cap = _vmem_capacity_bytes()
    vmem_limit = min(100 * 1024 * 1024, (vmem_cap * 3) // 4)
    block_budget = (vmem_limit * 7) // 10

    # Per-channel VMEM per grid step: double-buffered input + double-buffered output
    # + f32 padded scratch + ~8*h*w*4 B of live f32 temporaries (paired rows, pair
    # sums, accumulator) — the previous version under-counted these.
    per_ch = (2 * h * w * itemsize) + (2 * h * w * itemsize) \
             + hp * wp * 4 + 8 * h * w * 4
    tile_bc = max(1, min(bc, block_budget // per_ch))
    # Keep at least ~8 grid steps when there are enough channels: gives the pipeline a
    # steady state and load-balances v7x's 2 TensorCores (vs. 2 giant all-or-nothing steps).
    if bc > 1:
        tile_bc = min(tile_bc, max(1, pl.cdiv(bc, 8)))
    grid = (pl.cdiv(bc, tile_bc),)

    flops = 25 * bc * h * w                      # ~25 VALU ops per output element
    bytes_accessed = 2 * bc * h * w * itemsize   # read input + write output

    out = pl.pallas_call(
        _blur_kernel,
        out_shape=jax.ShapeDtypeStruct((bc, h, w), x.dtype),
        grid_spec=pltpu.PrefetchScalarGridSpec(
            num_scalar_prefetch=0,
            grid=grid,
            in_specs=[pl.BlockSpec((tile_bc, h, w), lambda i: (i, 0, 0))],
            out_specs=pl.BlockSpec((tile_bc, h, w), lambda i: (i, 0, 0)),
            scratch_shapes=[pltpu.VMEM((tile_bc, hp, wp), jnp.float32)],
        ),
        compiler_params=pltpu.CompilerParams(
            dimension_semantics=("parallel",),
            vmem_limit_bytes=int(vmem_limit),
        ),
        cost_estimate=pl.CostEstimate(
            flops=flops, transcendentals=0, bytes_accessed=bytes_accessed),
    )(x_flat)
    return out.reshape(b, c, h, w)


def _reference_blur(x):
    """Pure-JAX reference using lax.conv_general_dilated (matches F.conv2d)."""
    b, c, h, w = x.shape
    k = jnp.asarray(GAUSS_KERNEL, jnp.float32)[None, None]  # (1,1,5,5) OIHW
    x1 = x.reshape(b * c, 1, h, w)
    y = lax.conv_general_dilated(
        x1, k, window_strides=(1, 1), padding=((PAD, PAD), (PAD, PAD)),
        dimension_numbers=("NCHW", "OIHW", "NCHW"),
    )
    return y.reshape(b, c, h, w)


if __name__ == "__main__":
    key = jax.random.PRNGKey(0)
    B, C, H, W = 2, 4, 16, 16
    x = jax.random.normal(key, (B, C, H, W), dtype=jnp.float32)

    y = gaussian_blur5(x)
    y = jax.block_until_ready(y)

    y_ref = _reference_blur(x)
    assert y.shape == (B, C, H, W)
    assert jnp.allclose(y, y_ref, atol=1e-5, rtol=1e-5)

    print("KERNEL_OK")
</pallas_src>

<mosaic_0001>
module attributes {stable_mosaic.version = 11 : i64} {
  func.func @_blur_kernel(%arg0: i32, %arg1: memref<1x16x16xf32, #tpu.memory_space<vmem>>, %arg2: memref<1x16x16xf32, #tpu.memory_space<vmem>>, %arg3: memref<1x20x20xf32, #tpu.memory_space<vmem>>) attributes {dimension_semantics = [#tpu.dimension_semantics<parallel>], iteration_bounds = array<i64: 8>, scalar_prefetch = 0 : i64, scratch_operands = 1 : i64, tpu.core_type = #tpu.core_type<tc>, window_params = [{transform_indices = @transform_0, window_bounds = array<i64: 1, 16, 16>}, {transform_indices = @transform_1, window_bounds = array<i64: 1, 16, 16>}]} {
    %cst = arith.constant 0.000000e+00 : f32
    %0 = vector.broadcast %cst : f32 to vector<1x2x20xf32>
    %cst_0 = arith.constant 0.000000e+00 : f32
    %1 = vector.broadcast %cst_0 : f32 to vector<1x20x2xf32>
    %c0 = arith.constant 0 : index
    %c0_1 = arith.constant 0 : index
    %c0_2 = arith.constant 0 : index
    %2 = vector.load %arg3[%c0, %c0_1, %c0_2] : memref<1x20x20xf32, #tpu.memory_space<vmem>>, vector<1x2x20xf32>
    tpu.vector_store %arg3[%c0, %c0_1, %c0_2], %0 {strides = array<i32>} : memref<1x20x20xf32, #tpu.memory_space<vmem>>, vector<1x2x20xf32>,
    %c0_3 = arith.constant 0 : index
    %c18 = arith.constant 18 : index
    %c0_4 = arith.constant 0 : index
    %3 = vector.load %arg3[%c0_3, %c18, %c0_4] : memref<1x20x20xf32, #tpu.memory_space<vmem>>, vector<1x2x20xf32>
    tpu.vector_store %arg3[%c0_3, %c18, %c0_4], %0 {strides = array<i32>} : memref<1x20x20xf32, #tpu.memory_space<vmem>>, vector<1x2x20xf32>,
    %c0_5 = arith.constant 0 : index
    %c0_6 = arith.constant 0 : index
    %c0_7 = arith.constant 0 : index
    %4 = vector.load %arg3[%c0_5, %c0_6, %c0_7] : memref<1x20x20xf32, #tpu.memory_space<vmem>>, vector<1x20x2xf32>
    tpu.vector_store %arg3[%c0_5, %c0_6, %c0_7], %1 {strides = array<i32>} : memref<1x20x20xf32, #tpu.memory_space<vmem>>, vector<1x20x2xf32>,
    %c0_8 = arith.constant 0 : index
    %c0_9 = arith.constant 0 : index
    %c18_10 = arith.constant 18 : index
    %5 = vector.load %arg3[%c0_8, %c0_9, %c18_10] : memref<1x20x20xf32, #tpu.memory_space<vmem>>, vector<1x20x2xf32>
    tpu.vector_store %arg3[%c0_8, %c0_9, %c18_10], %1 {strides = array<i32>} : memref<1x20x20xf32, #tpu.memory_space<vmem>>, vector<1x20x2xf32>,
    %c0_11 = arith.constant 0 : index
    %c0_12 = arith.constant 0 : index
    %c0_13 = arith.constant 0 : index
    %6 = vector.load %arg1[%c0_11, %c0_12, %c0_13] : memref<1x16x16xf32, #tpu.memory_space<vmem>>, vector<1x16x16xf32>
    %c0_14 = arith.constant 0 : index
    %c2 = arith.constant 2 : index
    %c2_15 = arith.constant 2 : index
    %7 = vector.load %arg3[%c0_14, %c2, %c2_15] : memref<1x20x20xf32, #tpu.memory_space<vmem>>, vector<1x16x16xf32>
    tpu.vector_store %arg3[%c0_14, %c2, %c2_15], %6 {strides = array<i32>} : memref<1x20x20xf32, #tpu.memory_space<vmem>>, vector<1x16x16xf32>,
    %c0_16 = arith.constant 0 : index
    %c0_17 = arith.constant 0 : index
    %c0_18 = arith.constant 0 : index
    %8 = vector.load %arg3[%c0_16, %c0_17, %c0_18] : memref<1x20x20xf32, #tpu.memory_space<vmem>>, vector<1x16x20xf32>
    %c0_19 = arith.constant 0 : index
    %c4 = arith.constant 4 : index
    %c0_20 = arith.constant 0 : index
    %9 = vector.load %arg3[%c0_19, %c4, %c0_20] : memref<1x20x20xf32, #tpu.memory_space<vmem>>, vector<1x16x20xf32>
    %10 = arith.addf %8, %9 : vector<1x16x20xf32>
    %c0_21 = arith.constant 0 : index
    %c1 = arith.constant 1 : index
    %c0_22 = arith.constant 0 : index
    %11 = vector.load %arg3[%c0_21, %c1, %c0_22] : memref<1x20x20xf32, #tpu.memory_space<vmem>>, vector<1x16x20xf32>
    %c0_23 = arith.constant 0 : index
    %c3 = arith.constant 3 : index
    %c0_24 = arith.constant 0 : index
    %12 = vector.load %arg3[%c0_23, %c3, %c0_24] : memref<1x20x20xf32, #tpu.memory_space<vmem>>, vector<1x16x20xf32>
    %13 = arith.addf %11, %12 : vector<1x16x20xf32>
    %c0_25 = arith.constant 0 : index
    %c2_26 = arith.constant 2 : index
    %c0_27 = arith.constant 0 : index
    %14 = vector.load %arg3[%c0_25, %c2_26, %c0_27] : memref<1x20x20xf32, #tpu.memory_space<vmem>>, vector<1x16x20xf32>
    %15 = vector.extract_strided_slice %10 {offsets = [0, 0, 0], sizes = [1, 16, 16], strides = [1, 1, 1]} : vector<1x16x20xf32> to vector<1x16x16xf32>
    %16 = vector.extract_strided_slice %10 {offsets = [0, 0, 4], sizes = [1, 16, 16], strides = [1, 1, 1]} : vector<1x16x20xf32> to vector<1x16x16xf32>
    %17 = arith.addf %15, %16 : vector<1x16x16xf32>
    %18 = vector.extract_strided_slice %10 {offsets = [0, 0, 1], sizes = [1, 16, 16], strides = [1, 1, 1]} : vector<1x16x20xf32> to vector<1x16x16xf32>
    %19 = vector.extract_strided_slice %10 {offsets = [0, 0, 3], sizes = [1, 16, 16], strides = [1, 1, 1]} : vector<1x16x20xf32> to vector<1x16x16xf32>
    %20 = arith.addf %18, %19 : vector<1x16x16xf32>
    %cst_28 = arith.constant 7.000000e-04 : f32
    %21 = vector.broadcast %cst_28 : f32 to vector<1x16x16xf32>
    %22 = arith.mulf %21, %17 : vector<1x16x16xf32>
    %cst_29 = arith.constant 6.300000e-03 : f32
    %23 = vector.broadcast %cst_29 : f32 to vector<1x16x16xf32>
    %24 = arith.mulf %23, %20 : vector<1x16x16xf32>
    %25 = arith.addf %22, %24 : vector<1x16x16xf32>
    %26 = vector.extract_strided_slice %10 {offsets = [0, 0, 2], sizes = [1, 16, 16], strides = [1, 1, 1]} : vector<1x16x20xf32> to vector<1x16x16xf32>
    %cst_30 = arith.constant 1.290000e-02 : f32
    %27 = vector.broadcast %cst_30 : f32 to vector<1x16x16xf32>
    %28 = arith.mulf %27, %26 : vector<1x16x16xf32>
    %29 = arith.addf %25, %28 : vector<1x16x16xf32>
    %30 = vector.extract_strided_slice %13 {offsets = [0, 0, 0], sizes = [1, 16, 16], strides = [1, 1, 1]} : vector<1x16x20xf32> to vector<1x16x16xf32>
    %31 = vector.extract_strided_slice %13 {offsets = [0, 0, 4], sizes = [1, 16, 16], strides = [1, 1, 1]} : vector<1x16x20xf32> to vector<1x16x16xf32>
    %32 = arith.addf %30, %31 : vector<1x16x16xf32>
    %33 = vector.extract_strided_slice %13 {offsets = [0, 0, 1], sizes = [1, 16, 16], strides = [1, 1, 1]} : vector<1x16x20xf32> to vector<1x16x16xf32>
    %34 = vector.extract_strided_slice %13 {offsets = [0, 0, 3], sizes = [1, 16, 16], strides = [1, 1, 1]} : vector<1x16x20xf32> to vector<1x16x16xf32>
    %35 = arith.addf %33, %34 : vector<1x16x16xf32>
    %cst_31 = arith.constant 6.300000e-03 : f32
    %36 = vector.broadcast %cst_31 : f32 to vector<1x16x16xf32>
    %37 = arith.mulf %36, %32 : vector<1x16x16xf32>
    %cst_32 = arith.constant 5.430000e-02 : f32
    %38 = vector.broadcast %cst_32 : f32 to vector<1x16x16xf32>
    %39 = arith.mulf %38, %35 : vector<1x16x16xf32>
    %40 = arith.addf %37, %39 : vector<1x16x16xf32>
    %41 = vector.extract_strided_slice %13 {offsets = [0, 0, 2], sizes = [1, 16, 16], strides = [1, 1, 1]} : vector<1x16x20xf32> to vector<1x16x16xf32>
    %cst_33 = arith.constant 1.116000e-01 : f32
    %42 = vector.broadcast %cst_33 : f32 to vector<1x16x16xf32>
    %43 = arith.mulf %42, %41 : vector<1x16x16xf32>
    %44 = arith.addf %40, %43 : vector<1x16x16xf32>
    %45 = arith.addf %29, %44 : vector<1x16x16xf32>
    %46 = vector.extract_strided_slice %14 {offsets = [0, 0, 0], sizes = [1, 16, 16], strides = [1, 1, 1]} : vector<1x16x20xf32> to vector<1x16x16xf32>
    %47 = vector.extract_strided_slice %14 {offsets = [0, 0, 4], sizes = [1, 16, 16], strides = [1, 1, 1]} : vector<1x16x20xf32> to vector<1x16x16xf32>
    %48 = arith.addf %46, %47 : vector<1x16x16xf32>
    %49 = vector.extract_strided_slice %14 {offsets = [0, 0, 1], sizes = [1, 16, 16], strides = [1, 1, 1]} : vector<1x16x20xf32> to vector<1x16x16xf32>
    %50 = vector.extract_strided_slice %14 {offsets = [0, 0, 3], sizes = [1, 16, 16], strides = [1, 1, 1]} : vector<1x16x20xf32> to vector<1x16x16xf32>
    %51 = arith.addf %49, %50 : vector<1x16x16xf32>
    %cst_34 = arith.constant 1.290000e-02 : f32
    %52 = vector.broadcast %cst_34 : f32 to vector<1x16x16xf32>
    %53 = arith.mulf %52, %48 : vector<1x16x16xf32>
    %cst_35 = arith.constant 1.116000e-01 : f32
    %54 = vector.broadcast %cst_35 : f32 to vector<1x16x16xf32>
    %55 = arith.mulf %54, %51 : vector<1x16x16xf32>
    %56 = arith.addf %53, %55 : vector<1x16x16xf32>
    %57 = vector.extract_strided_slice %14 {offsets = [0, 0, 2], sizes = [1, 16, 16], strides = [1, 1, 1]} : vector<1x16x20xf32> to vector<1x16x16xf32>
    %cst_36 = arith.constant 2.292000e-01 : f32
    %58 = vector.broadcast %cst_36 : f32 to vector<1x16x16xf32>
    %59 = arith.mulf %58, %57 : vector<1x16x16xf32>
    %60 = arith.addf %56, %59 : vector<1x16x16xf32>
    %61 = arith.addf %45, %60 : vector<1x16x16xf32>
    %c0_37 = arith.constant 0 : index
    %c0_38 = arith.constant 0 : index
    %c0_39 = arith.constant 0 : index
    %62 = vector.load %arg2[%c0_37, %c0_38, %c0_39] : memref<1x16x16xf32, #tpu.memory_space<vmem>>, vector<1x16x16xf32>
    tpu.vector_store %arg2[%c0_37, %c0_38, %c0_39], %61 {strides = array<i32>} : memref<1x16x16xf32, #tpu.memory_space<vmem>>, vector<1x16x16xf32>,
    return
  }
  func.func @transform_0(%arg0: i32) -> (i32, i32, i32) {
    %c0_i32 = arith.constant 0 : i32
    %c0_i32_0 = arith.constant 0 : i32
    %c0_i32_1 = arith.constant 0 : i32
    return %arg0, %c0_i32, %c0_i32_0 : i32, i32, i32
  }
  func.func @transform_1(%arg0: i32) -> (i32, i32, i32) {
    %c0_i32 = arith.constant 0 : i32
    %c0_i32_0 = arith.constant 0 : i32
    %c0_i32_1 = arith.constant 0 : i32
    return %arg0, %c0_i32, %c0_i32_0 : i32, i32, i32
  }
}

</mosaic_0001>

<bundles_post_ra>
// kernel: tpu_custom_call.1
= control target key start
LH: loop header
LB: loop body
LE: loop exit
PB: predicated region body
PF: predicated region fallthrough
CT: control target
= control target key end

     0   :  { %6 = vsyncpa [#allocation4], 0  ;;  %s811_s0 = inlined_call_operand.hbm [shape: f32[8,16,16], index: 0, kind: input, shape index: {}]   ;;  %s812_s1 = inlined_call_operand.hbm [shape: f32[8,16,16], index: 1, kind: output, shape index: {}]  }
   0x1   :  { %8 = vsyncpa [#allocation4 + $0x1], 0 }
   0x2   :  { %9 = vsyncpa [#allocation5], 0 }
   0x3   :  { %11 = vsyncpa [#allocation5 + $0x1], 0  ;;  %s591_s6 = smov 0   ;;  %s593_s7 = smov 0  }
   0x4   :  { %s595_s8 = smov 0   ;;  %s597_s9 = smov 0  }
   0x5 LB: > { %s612_s10 = sadd.s32 4294967295, %s568_s9   ;;  %s401_s11 = sadd.s32 4294967294, %s568_s9   ;;  %s568_s9 = sphi %s597_s9, %s824_s9   ;;  %s564_s8 = sphi %s595_s8, %s823_s8   ;;  %s560_s7 = sphi %s593_s7, %s822_s7   ;;  %s556_s6 = sphi %s591_s6, %s821_s6  }
   0x6   : > { %s616_s12 = sadd.s32 1, %s568_s9   ;;  %s24_s13 = sadd.s32 1, %s564_s8 }
   0x7   : > { %s21_s14 = ssub.s32 %s568_s9, %s616_s12  ;;  %p31_p0 = scmp.ne.s32.totalorder %s564_s8, %s560_s7 }
   0x8   : > { %p22_p1 = scmp.eq.s32.totalorder %s21_s14, 0  ;;  %p32_p2 = scmp.eq.s32.totalorder %s568_s9, 0 }
   0x9   : > { %p37_p3 = scmp.ne.s32.totalorder %s560_s7, %s556_s6  ;;  %p38_p4 = scmp.eq.s32.totalorder %s612_s10, 0 }
   0xa   : > { %s628_s15 = scalar_select %p22_p1, %s564_s8, %s24_s13  }
   0xb   : > { %p630_p5 = por %p32_p2, %p31_p0  ;;  %p634_p6 = por %p38_p4, %p37_p3 }
   0xc   : > { %p61_p7 = scmp.eq.s32.totalorder %s612_s10, 7  ;;  %p67_p8 = scmp.eq.s32.totalorder %s401_s11, 7 }
   0xd   : > { %p429_p9 = scmp.lt.s32.totalorder %s568_s9, 8  ;;  %s87_s20 = sand.u32 1, %s564_s8  }
   0xe   : > { %p640_p10 = por %p61_p7, %p31_p0  ;;  %p644_p11 = por %p67_p8, %p37_p3 }
   0xf   : > { %s415_s21 = sshll.u32 %s568_s9, 8  ;;  %s404_s22 = sshll.u32 %s87_s20, 4 }
  0x10   : > { %s816_s18 = scalar_select %p640_p10, 1, 0 }
  0x11   : > { %s817_s19 = scalar_select %p644_p11, 1, 0 }
  0x12   : > { %s653_s25 = scalar_lea.hbm %s811_s0, %s415_s21  ;;  %s91_s26 = scalar_lea.vmem [#allocation3], %s404_s22 }
  0x13   : > { %s98_s27 = sshll.u32 %s91_s26, 4  ;;  %p657_p12 = pnand %p429_p9, %p630_p5  ;;  %s661_s27 = int_to_ptr.vmem [resolvable:$true] %s98_s27 }
  0x14   : > { %s663_s29 = scalar_lea.sflag [#allocation4], %s87_s20  ;;  %s472_s30 = scalar_lea.hbm %s653_s25, 256 }
  0x15   : > { %p473_p13 = scmp.ne.s32.totalorder %s653_s25, %s472_s30  ;;  %p474_p0 = pneg %p657_p12 }
  0x16   : > { %s477_s4 = scalar_lea.hbm %s811_s0, 2048  ;;  %p478_p3 = scmp.lt.u32.totalorder %s653_s25, %s811_s0 }
  0x17   : > { %p475_p1 = pnand %p474_p0, %p473_p13  ;;  %p479_p4 = scmp.lt.u32.totalorder %s477_s4, %s472_s30 }
  0x18   : > { %p481_p7 = scmp.lt.u32.totalorder %s472_s30, %s653_s25 }
  0x19   : > { %p476_p2 = pneg %p475_p1  ;;  %p480_p5 = por %p479_p4, %p478_p3 }
  0x1b   : > { %p482_p8 = por %p481_p7, %p480_p5 }
  0x1d   : > { %p483_p9 = pnand %p482_p8, %p476_p2 }
  0x1f   : > { %486 = shalt.err (!%p483_p9)
}
  0x20   : > { %s487_s13 = scalar_lea.vmem %s661_s27, 256  ;;  %s570_s14 = smov [#allocation3]  }
  0x21   : > { %p488_p13 = scmp.ne.s32.totalorder %s661_s27, %s487_s13  ;;  %s492_s16 = sshll.u32 %s570_s14, 4  ;;  %s493_s16 = int_to_ptr.vmem [resolvable:$false] %s492_s16 }
  0x22   : > { %s494_s20 = scalar_lea.vmem %s493_s16, 512  ;;  %p495_p10 = scmp.lt.s32.totalorder %s661_s27, %s493_s16 }
  0x23   : > { %p490_p1 = pnand %p488_p13, %p474_p0  ;;  %p496_p3 = scmp.lt.s32.totalorder %s494_s20, %s487_s13 }
  0x25   : > { %p491_p11 = pneg %p490_p1  ;;  %p497_p4 = por %p496_p3, %p495_p10 }
  0x27   : > { %p498_p5 = pnand %p497_p4, %p491_p11 }
  0x29   : > { %501 = shalt.err (!%p498_p5)
}
  0x2a   : > { %s571_s21 = smov 128   ;;  %s572_s22 = smov 8  }
  0x2b   : > { %424 = dma.hbm_to_vmem [thread:$0]  (!%p657_p12), %s653_s25, 256, %s661_s27, %s663_s29, %s571_s21, %s571_s21, %s572_s22  }
  0x2c   : > { %p407_p0 = scmp.ge.s32.totalorder %s568_s9, 1  ;;  %p106_p2 = scmp.lt.s32.totalorder %s568_s9, 9 }
  0x2e   : > { %p107_p7 = pnand %p407_p0, %p106_p2 }
  0x2f   : > { %s694_s23 = sand.u32 (!%p107_p7), 1, %s560_s7  }
  0x30   : > { %110 = sbr.rel (%p107_p7) target bundleno = 466 (0x1d2), region = 24  ;;  %s408_s24 = sshll.u32 (!%p107_p7), %s694_s23, 4 }
  0x31   : > { %s113_s26 = scalar_lea.sflag (!%p107_p7), [#allocation4], %s694_s23  ;;  %s116_s30 = scalar_lea.vmem (!%p107_p7), [#allocation3], %s408_s24 }
  0x37   : > { %547 = dma.done.wait (%p634_p6), %s113_s26, 256  }
  0x38   : > { %549 = vsyncadd (%p634_p6), %s113_s26, 4294967040  ;;  %vm135_vm0 = vcmask 156672   ;;  %vm138_vm1 = vcmask 15360   ;;  %vm143_vm2 = vcmask 162960   ;;  %v573_v0 = vmov 0.0   ;;  %v148_v1 = vld [vmem:[%s116_s30] sm:$0xff] }
  0x39   : > { %136 = vst.msk [vmem:[#allocation2] sm:$0x3] %vm135_vm0, %v573_v0  ;;  %137 = vst.msk [vmem:[#allocation2 + $0x12] sm:$0x3] %vm135_vm0, %v573_v0  ;;  %vm141_vm3 = vcmask 11264   ;;  %vm146_vm4 = vcmask 158864  }
  0x3a   : > { %140 = vst.msk [vmem:[#allocation2 + $0x8] sm:$0xff] %vm138_vm1, %v573_v0  ;;  %139 = vst.msk [vmem:[#allocation2] sm:$0xff] %vm138_vm1, %v573_v0  ;;  %s574_s25 = smov 2   ;;  %v149_v2 = vld [vmem:[%s116_s30 + $0x8] sm:$0xff]  ;;  %vm158_vm5 = vcmask 146448   ;;  %s575_s17 = smov 126  }
  0x3b   : > { %145 = vst.msk [vmem:[#allocation2 + $0x8] sm:$0xff] %vm143_vm2, %v573_v0  ;;  %144 = vst.msk [vmem:[#allocation2] sm:$0xff] %vm143_vm2, %v573_v0  ;;  %152 = vrot.lane.b32.xlu0 %v148_v1, %s574_s25  ;;  %s576_s27 = smov 124   ;;  %s577_s28 = smov 127   ;;  %vm311_vm6 = vcmask 130048  }
  0x3c   : > { %142 = vst.msk [vmem:[#allocation2 + $0x10] sm:$0xf] %vm141_vm3, %v573_v0  ;;  %s134_s29 = scalar_lea.vmem [#allocation6], %s408_s24  ;;  %s416_s2 = sshll.u32 %s612_s10, 8 }
  0x3d   : > { %147 = vst.msk [vmem:[#allocation2 + $0x10] sm:$0xf] %vm146_vm4, %v573_v0  ;;  %s328_s3 = sshll.u32 %s134_s29, 4  ;;  %s765_s11 = scalar_lea.hbm %s812_s1, %s416_s2  ;;  %s767_s3 = int_to_ptr.vmem [resolvable:$true] %s328_s3 }
  0x3e   : > { %s315_s13 = scalar_lea.sflag [#allocation5], %s694_s23  ;;  %s502_s14 = scalar_lea.vmem %s767_s3, 256 }
  0x3f   : > { %154 = vrot.lane.b32.xlu0 %v149_v2, %s574_s25  ;;  %p503_p6 = scmp.ne.s32.totalorder %s767_s3, %s502_s14  ;;  %p819_p10 = scmp.ne.s32.totalorder %s816_s18, 0 }
  0x40   : > { %s578_s10 = smov [#allocation6]  }
  0x41   : > { %p504_p11 = pnand %p503_p6, %p819_p10  ;;  %s506_s16 = sshll.u32 %s578_s10, 4  ;;  %s507_s16 = int_to_ptr.vmem [resolvable:$false] %s506_s16 }
  0x42   : > { %s508_s20 = scalar_lea.vmem %s507_s16, 512  ;;  %p509_p8 = scmp.lt.s32.totalorder %s767_s3, %s507_s16 }
  0x43   : > { %p505_p12 = pneg %p504_p11  ;;  %p510_p9 = scmp.lt.s32.totalorder %s508_s20, %s502_s14 }
  0x45   : > { %p511_p13 = por %p510_p9, %p509_p8 }
  0x47   : > { %p512_p1 = pnand %p511_p13, %p505_p12 }
  0xad   : > { %v153_v3 = vpop.permute.xlu0 %152 }
  0xae   : > { %159 = vst.msk [vmem:[#allocation2 + $0x2] sm:$0xff] %vm158_vm5, %v153_v3 }
  0xb1   : > { %v155_v4 = vpop.permute.xlu0 %154 }
  0xb2   : > { %160 = vst.msk [vmem:[#allocation2 + $0xa] sm:$0xff] %vm158_vm5, %v155_v4 }
  0xb5   : > { %v167_v5 = vld [vmem:[#allocation2 + $0x1] sm:$0xff] }
  0xb6   : > { %v161_v7 = vld [vmem:[#allocation2] sm:$0xff] }
  0xb7   : > { %v714_v14 = vld [vmem:[#allocation2 + $0x2] sm:$0xff] }
  0xb8   : > { %v297_v40 = vmul.f32 0.2292, %v714_v14 }
  0xb9   : > { %v169_v6 = vld [vmem:[#allocation2 + $0x3] sm:$0xff]  ;;  %v164_v12 = vld [vmem:[#allocation2 + $0xc] sm:$0xff] }
  0xba   : > { %v163_v8 = vld [vmem:[#allocation2 + $0x4] sm:$0xff]  ;;  %v704_v9 = vadd.f32 %v169_v6, %v167_v5 }
  0xbb   : > { %v706_v10 = vadd.f32 %v163_v8, %v161_v7  ;;  %v162_v11 = vld [vmem:[#allocation2 + $0x8] sm:$0xff] }
  0xbc   : > { %229 = vrot.lane.b32.xlu0 %v704_v9, %s575_s17  ;;  %v712_v13 = vadd.f32 %v164_v12, %v162_v11  ;;  %v168_v15 = vld [vmem:[#allocation2 + $0x9] sm:$0xff]  ;;  %v251_v20 = vmul.f32 0.1116, %v704_v9 }
  0xbd   : > { %185 = vrot.lane.b32.xlu1 %v706_v10, %s575_s17  ;;  %v170_v16 = vld [vmem:[#allocation2 + $0xb] sm:$0xff]  ;;  %v207_v19 = vmul.f32 0.0129, %v706_v10 }
  0xbe   : > { %v720_v17 = vadd.f32 %v170_v16, %v168_v15  ;;  %v725_v18 = vld [vmem:[#allocation2 + $0xa] sm:$0xff]  ;;  %v208_v21 = vmul.f32 0.0129, %v712_v13 }
  0xbf   : > { %v298_v42 = vmul.f32 0.2292, %v725_v18 }
  0xc0   : > { %275 = vrot.lane.b32.xlu0 %v714_v14, %s575_s17  ;;  %v252_v22 = vmul.f32 0.1116, %v720_v17 }
  0xc1   : > { %187 = vrot.lane.b32.xlu1 %v712_v13, %s575_s17 }
  0xc4   : > { %267 = vrot.lane.b32.xlu0 %v714_v14, %s576_s27 }
  0xc5   : > { %231 = vrot.lane.b32.xlu1 %v720_v17, %s575_s17 }
  0xc8   : > { %177 = vrot.lane.b32.xlu0 %v706_v10, %s576_s27 }
  0xc9   : > { %277 = vrot.lane.b32.xlu1 %v725_v18, %s575_s17 }
  0xcc   : > { %221 = vrot.lane.b32.xlu0 %v704_v9, %s576_s27 }
  0xcd   : > { %269 = vrot.lane.b32.xlu1 %v725_v18, %s576_s27 }
  0xd0   : > { %211 = vrot.lane.b32.xlu0 %v207_v19, %s575_s17 }
  0xd1   : > { %179 = vrot.lane.b32.xlu1 %v712_v13, %s576_s27 }
  0xd4   : > { %255 = vrot.lane.b32.xlu0 %v251_v20, %s575_s17 }
  0xd5   : > { %223 = vrot.lane.b32.xlu1 %v720_v17, %s576_s27 }
  0xd9   : > { %213 = vrot.lane.b32.xlu1 %v208_v21, %s575_s17 }
  0xdd   : > { %257 = vrot.lane.b32.xlu1 %v252_v22, %s575_s17 }
 0x12e   : > { %v230_v23 = vpop.permute.xlu0 %229 }
 0x12f   : > { %v186_v24 = vpop.permute.xlu1 %185  ;;  %v235_v31 = vadd.f32 %v230_v23, %v704_v9 }
 0x130   : > { %v191_v28 = vadd.f32 %v186_v24, %v706_v10 }
 0x131   : > { %v239_v35 = vmul.f32 0.0543, %v235_v31 }
 0x132   : > { %v276_v25 = vpop.permute.xlu0 %275  ;;  %v195_v32 = vmul.f32 0.0063, %v191_v28 }
 0x133   : > { %v188_v26 = vpop.permute.xlu1 %187  ;;  %v281_v27 = vadd.f32 %v276_v25, %v714_v14 }
 0x134   : > { %v192_v36 = vadd.f32 %v188_v26, %v712_v13 }
 0x135   : > { %v285_v29 = vmul.f32 0.1116, %v281_v27 }
 0x136   : > { %v196_v38 = vmul.f32 0.0063, %v192_v36  ;;  %v268_v43 = vpop.permute.xlu0 %267 }
 0x137   : > { %v232_v30 = vpop.permute.xlu1 %231  ;;  %289 = vrot.lane.b32.xlu0 %v285_v29, %s577_s28  ;;  %v273_v57 = vadd.f32 %v268_v43, %v714_v14 }
 0x138   : > { %v236_v39 = vadd.f32 %v232_v30, %v720_v17 }
 0x139   : > { %v283_v63 = vmul.f32 0.0129, %v273_v57 }
 0x13a   : > { %v240_v41 = vmul.f32 0.0543, %v236_v39  ;;  %v178_v44 = vpop.permute.xlu0 %177 }
 0x13b   : > { %v278_v33 = vpop.permute.xlu1 %277  ;;  %199 = vrot.lane.b32.xlu0 %v195_v32, %s577_s28  ;;  %v183_v53 = vadd.f32 %v178_v44, %v706_v10 }
 0x13c   : > { %v282_v34 = vadd.f32 %v278_v33, %v725_v18 }
 0x13d   : > { %v193_v58 = vmul.f32 0.0007, %v183_v53 }
 0x13e   : > { %v286_v37 = vmul.f32 0.1116, %v282_v34  ;;  %v222_v46 = vpop.permute.xlu0 %221 }
 0x13f   : > { %243 = vrot.lane.b32.xlu0 %v239_v35, %s577_s28  ;;  %v270_v45 = vpop.permute.xlu1 %269  ;;  %v227_v54 = vadd.f32 %v222_v46, %v704_v9 }
 0x140   : > { %291 = vrot.lane.b32.xlu1 %v286_v37, %s577_s28  ;;  %v274_v8 = vadd.f32 %v270_v45, %v725_v18 }
 0x141   : > { %v237_v59 = vmul.f32 0.0063, %v227_v54 }
 0x142   : > { %v212_v48 = vpop.permute.xlu0 %211  ;;  %v284_v16 = vmul.f32 0.0129, %v274_v8 }
 0x143   : > { %301 = vrot.lane.b32.xlu0 %v297_v40, %s575_s17  ;;  %v180_v47 = vpop.permute.xlu1 %179 }
 0x144   : > { %201 = vrot.lane.b32.xlu1 %v196_v38, %s577_s28  ;;  %v184_v0 = vadd.f32 %v180_v47, %v712_v13 }
 0x146   : > { %v256_v50 = vpop.permute.xlu0 %255  ;;  %v194_v9 = vmul.f32 0.0007, %v184_v0 }
 0x147   : > { %v224_v49 = vpop.permute.xlu1 %223 }
 0x148   : > { %245 = vrot.lane.b32.xlu1 %v240_v41, %s577_s28  ;;  %v228_v2 = vadd.f32 %v224_v49, %v720_v17 }
 0x14a   : > { %v238_v12 = vmul.f32 0.0063, %v228_v2 }
 0x14b   : > { %v214_v51 = vpop.permute.xlu1 %213 }
 0x14c   : > { %303 = vrot.lane.b32.xlu1 %v298_v42, %s575_s17 }
 0x14f   : > { %v258_v55 = vpop.permute.xlu1 %257 }
 0x1a9   : > { %v290_v52 = vpop.permute.xlu0 %289 }
 0x1aa   : > { %v295_v3 = vadd.f32 %v290_v52, %v283_v63 }
 0x1ad   : > { %v200_v56 = vpop.permute.xlu0 %199 }
 0x1ae   : > { %v205_v60 = vadd.f32 %v200_v56, %v193_v58 }
 0x1b0   : > { %v217_v4 = vadd.f32 %v212_v48, %v205_v60 }
 0x1b1   : > { %v244_v62 = vpop.permute.xlu0 %243 }
 0x1b2   : > { %v292_v61 = vpop.permute.xlu1 %291  ;;  %v249_v1 = vadd.f32 %v244_v62, %v237_v59 }
 0x1b3   : > { %v296_v19 = vadd.f32 %v292_v61, %v284_v16 }
 0x1b4   : > { %v261_v5 = vadd.f32 %v256_v50, %v249_v1 }
 0x1b5   : > { %v302_v7 = vpop.permute.xlu0 %301 }
 0x1b6   : > { %v202_v6 = vpop.permute.xlu1 %201  ;;  %v263_v10 = vadd.f32 %v261_v5, %v217_v4  ;;  %v307_v11 = vadd.f32 %v302_v7, %v295_v3 }
 0x1b7   : > { %v206_v14 = vadd.f32 %v202_v6, %v194_v9 }
 0x1b8   : > { %v309_v15 = vadd.f32 %v307_v11, %v263_v10 }
 0x1b9   : > { %v218_v20 = vadd.f32 %v214_v51, %v206_v14 }
 0x1ba   : > { %v246_v13 = vpop.permute.xlu1 %245  ;;  %312 = vst.msk [vmem:[%s134_s29] sm:$0xff] %vm311_vm6, %v309_v15 }
 0x1bb   : > { %v250_v17 = vadd.f32 %v246_v13, %v238_v12 }
 0x1bd   : > { %v262_v18 = vadd.f32 %v258_v55, %v250_v17 }
 0x1be   : > { %v304_v21 = vpop.permute.xlu1 %303 }
 0x1bf   : > { %v264_v22 = vadd.f32 %v262_v18, %v218_v20  ;;  %v308_v23 = vadd.f32 %v304_v21, %v296_v19 }
 0x1c1   : > { %v310_v24 = vadd.f32 %v308_v23, %v264_v22 }
 0x1c3   : > { %313 = vst.msk [vmem:[%s134_s29 + $0x8] sm:$0xff] %vm311_vm6, %v310_v24 }
 0x1c4   : > { %515 = shalt.err (!%p512_p1)
}
 0x1c5   : > { %s516_s21 = scalar_lea.hbm %s765_s11, 256  ;;  %s520_s26 = scalar_lea.hbm %s812_s1, 2048 }
 0x1c6   : > { %p517_p3 = scmp.ne.s32.totalorder %s765_s11, %s516_s21  ;;  %p521_p0 = scmp.lt.u32.totalorder %s765_s11, %s812_s1 }
 0x1c7   : > { %p522_p2 = scmp.lt.u32.totalorder %s520_s26, %s516_s21  ;;  %p524_p6 = scmp.lt.u32.totalorder %s516_s21, %s765_s11 }
 0x1c8   : > { %p518_p4 = pnand %p517_p3, %p819_p10 }
 0x1c9   : > { %p523_p7 = por %p522_p2, %p521_p0 }
 0x1ca   : > { %p519_p5 = pneg %p518_p4 }
 0x1cb   : > { %p525_p11 = por %p524_p6, %p523_p7 }
 0x1cd   : > { %p526_p12 = pnand %p525_p11, %p519_p5 }
 0x1cf   : > { %529 = shalt.err (!%p526_p12)
}
 0x1d0   : > { %s579_s17 = smov 128   ;;  %s580_s27 = smov 8  }
 0x1d1   : > { %419 = dma.vmem_to_hbm [thread:$0]  (%p819_p10), %s767_s3, 256, %s765_s11, %s315_s13, %s579_s17, %s579_s17, %s580_s27  }
 0x1d2 PF: > { %p430_p8 = scmp.ge.s32.totalorder %s568_s9, 2  ;;  %s343_s28 = sand.u32 1, %s556_s6  }
 0x1d3   : > { %p820_p9 = scmp.ne.s32.totalorder %s817_s19, 0  ;;  %s344_s29 = scalar_lea.sflag [#allocation5], %s343_s28 }
 0x1d5   : > { %p426_p13 = pnand %p430_p8, %p820_p9 }
 0x1d7   : > { %551 = dma.done.wait (!%p426_p13), %s344_s29, 256  }
 0x1d8   : > { %553 = vsyncadd (!%p426_p13), %s344_s29, 4294967040  ;;  %p14_p1 = scmp.ge.s32.totalorder %s616_s12, 10   ;;  %s821_s6 = smov %s560_s7 }
 0x1d9   : > { %s822_s7 = smov %s564_s8  ;;  %s823_s8 = smov %s628_s15 }
 0x1da   : > { %s824_s9 = smov %s616_s12  ;;  %16 = sbr.rel (!%p14_p1) target bundleno = 5 (0x5), region = 69 }
 0x1e1   :  { %349 = vsyncpa [#allocation4], 1 }
 0x1e2   :  { %351 = vsyncpa [#allocation4 + $0x1], 1 }
 0x1e3   :  { %352 = vsyncpa [#allocation5], 1 }
 0x1e4   :  { %354 = vsyncpa [#allocation5 + $0x1], 1 }

</bundles_post_ra>
